<compile_context>
chip_gen: v6e
topology: v6e:2x2x1
jax: 0.10.0
libtpu: 0.0.40
codegen_flags: <defaults>
</compile_context>

<pallas_src>
import jax
import jax.numpy as jnp
from jax.experimental import pallas as pl
from jax.experimental.pallas import tpu as pltpu


def _cdiv(a, b):
    return -(-a // b)


def _embedding_kernel(idx_ref, table_ref, out_ref):
    # idx_ref:   (TILE_N, 1) int32  gene ids for this tile
    # table_ref: (K, D)      bf16   [hi; mid; lo] bf16 split of the f32 table,
    #                               K = 3 * Vp, resident (constant block index)
    # out_ref:   (TILE_N, D) f32    gathered embeddings
    idx = idx_ref[...]                                   # (TILE_N, 1)
    k = table_ref.shape[0]
    vp = k // 3                                          # padded vocab (x128)

    # Grid-invariant lane iota: one (1, K) row; the compare broadcasts it
    # against the (TILE_N, 1) idx column (no (TILE_N, K) viota per step).
    col = jax.lax.broadcasted_iota(jnp.int32, (1, k), 1)
    # Reduce column ids mod Vp so each of the 3 stacked slabs is addressed by
    # the same gene id -> 3 ones per one-hot row -> dot yields hi+mid+lo.
    col = jnp.where(col >= vp, col - vp, col)
    col = jnp.where(col >= vp, col - vp, col)

    onehot = (idx == col).astype(jnp.bfloat16)           # (TILE_N, K) exact 0/1
    out_ref[...] = jnp.dot(
        onehot, table_ref[...], preferred_element_type=jnp.float32
    ).astype(out_ref.dtype)


def gene_encoder_forward(x, table, *, tile_n=4096, use_pallas=None):
    """Pallas implementation of GeneEncoder.forward (nn.Embedding lookup).

    x:     (B, L) integer gene ids in [0, gene_size)
    table: (V, D) float32 embedding table (row `pad_token_id` zeroed)
    returns (B, L, D) float32
    """
    B, L = x.shape
    V, D = table.shape
    N = B * L

    if use_pallas is None:
        # Tiny workloads: a fused XLA gather beats any kernel launch.
        use_pallas = N >= 4096
    if not use_pallas:
        return table[x]

    # --- host-side table prep ------------------------------------------------
    # Pad vocab to a multiple of 128 (lane-dense compare, native MXU K) and
    # split the f32 table into hi/mid/lo bf16 slabs stacked along K so a
    # single bf16 MXU contraction reconstructs the f32 row to ~2^-24 relative
    # error (avoids the 3-6x pass-decomposed f32 matmul on v6e/v7x).
    Vp = max(128, _cdiv(V, 128) * 128)
    table_f32 = jnp.zeros((Vp, D), jnp.float32).at[:V, :].set(
        table.astype(jnp.float32))
    hi = table_f32.astype(jnp.bfloat16)
    r1 = table_f32 - hi.astype(jnp.float32)
    mid = r1.astype(jnp.bfloat16)
    lo = (r1 - mid.astype(jnp.float32)).astype(jnp.bfloat16)
    table_split = jnp.concatenate([hi, mid, lo], axis=0)     # (3*Vp, D) bf16

    # --- tile selection --------------------------------------------------
    # Big tiles so per-step work >> grid-step overhead, but keep >= 2 grid
    # steps for mid-size N so "parallel" can use both TensorCores on v7x.
    ntiles = max(1, _cdiv(N, tile_n))
    if N >= 2048 and ntiles < 2:
        ntiles = 2
    tn = _cdiv(_cdiv(N, ntiles), 8) * 8      # sublane multiple of 8
    grid = (_cdiv(N, tn),)                   # ragged last block masked by Pallas

    idx = x.reshape(N, 1).astype(jnp.int32)

    out = pl.pallas_call(
        _embedding_kernel,
        # Exact (N, D) output: no Np padding, no post-kernel slice copy.
        out_shape=jax.ShapeDtypeStruct((N, D), jnp.float32),
        grid_spec=pltpu.PrefetchScalarGridSpec(
            num_scalar_prefetch=0,
            grid=grid,
            in_specs=[
                # idx tile streams with the grid (double-buffered).
                # NOTE: a (tn, 1) int32 block inflates to tn*128*4 B in VMEM
                # (lane padding); accounted for in the tile_n default.
                pl.BlockSpec((tn, 1), lambda i: (i, 0)),
                # split table stays resident: constant block index, ~36 KB.
                pl.BlockSpec((3 * Vp, D), lambda i: (0, 0)),
            ],
            out_specs=pl.BlockSpec((tn, D), lambda i: (i, 0)),
        ),
        compiler_params=pltpu.CompilerParams(
            # Independent tiles -> megacore sharding (2 TCs on v7x).
            dimension_semantics=("parallel",),
            # Larger tiles than v5e's 16 MiB default scoped budget allows;
            # 32 MiB is within physical VMEM on every generation.
            vmem_limit_bytes=32 * 1024 * 1024,
        ),
        cost_estimate=pl.CostEstimate(
            flops=2 * grid[0] * tn * (3 * Vp) * D,
            bytes_accessed=N * 4 + N * D * 4 + 3 * Vp * D * 2,
            transcendentals=0,
        ),
    )(idx, table_split)

    # (N, D) -> (B, L, D) is a free reshape (no data movement).
    return out.reshape(B, L, D).astype(table.dtype)


def init_gene_encoder_params(key, gene_size=50, gene_dims=48, pad_token_id=0):
    """Synthetic init mirroring nn.Embedding: N(0,1) weights, padding row zeroed."""
    table = jax.random.normal(key, (gene_size, gene_dims), dtype=jnp.float32)
    table = table.at[pad_token_id].set(0.0)
    return table


if __name__ == "__main__":
    key = jax.random.PRNGKey(0)
    k_table, k_idx, k_idx2 = jax.random.split(key, 3)

    gene_size, gene_dims, pad_token_id = 50, 48, 0
    table = init_gene_encoder_params(k_table, gene_size, gene_dims, pad_token_id)

    # --- small module-sized case, force the Pallas path -----------------------
    B, L = 2, 8
    x = jax.random.randint(k_idx, (B, L), 0, gene_size, dtype=jnp.int32)
    out = jax.block_until_ready(gene_encoder_forward(x, table, use_pallas=True))
    ref = table[x]
    assert out.shape == (B, L, gene_dims)
    assert jnp.allclose(out, ref, atol=1e-5, rtol=1e-5), "mismatch (small case)"

    # --- multi-tile case: 2 "parallel" grid steps + ragged last block ---------
    B2, L2 = 3, 701                      # N = 2103 -> tn = 1056, grid = (2,)
    x2 = jax.random.randint(k_idx2, (B2, L2), 0, gene_size, dtype=jnp.int32)
    x2 = x2.at[0, 0].set(pad_token_id)   # exercise the padding_idx row
    out2 = jax.block_until_ready(gene_encoder_forward(x2, table, use_pallas=True))
    ref2 = table[x2]
    assert out2.shape == (B2, L2, gene_dims)
    assert jnp.allclose(out2, ref2, atol=1e-5, rtol=1e-5), "mismatch (tiled case)"
    assert jnp.all(out2[0, 0] == 0.0), "padding row must be zero"

    print("KERNEL_OK")
</pallas_src>

<mosaic_0001>
module attributes {stable_mosaic.version = 11 : i64} {
  func.func @_embedding_kernel(%arg0: i32, %arg1: memref<16x1xi32, #tpu.memory_space<vmem>>, %arg2: memref<384x48xbf16, #tpu.memory_space<vmem>>, %arg3: memref<16x48xf32, #tpu.memory_space<vmem>>) attributes {dimension_semantics = [#tpu.dimension_semantics<parallel>], iteration_bounds = array<i64: 1>, scalar_prefetch = 0 : i64, scratch_operands = 0 : i64, tpu.core_type = #tpu.core_type<tc>, window_params = [{transform_indices = @transform_0, window_bounds = array<i64: 16, 1>}, {pipeline_mode = #tpu.pipeline_mode<synchronous>, transform_indices = @transform_1, window_bounds = array<i64: 384, 48>}, {transform_indices = @transform_2, window_bounds = array<i64: 16, 48>}]} {
    %c0 = arith.constant 0 : index
    %c0_0 = arith.constant 0 : index
    %0 = vector.load %arg1[%c0, %c0_0] : memref<16x1xi32, #tpu.memory_space<vmem>>, vector<16x1xi32>
    %1 = tpu.iota {dimensions = array<i32: 1>} : vector<1x384xi32>
    %c128_i32 = arith.constant 128 : i32
    %2 = vector.broadcast %c128_i32 : i32 to vector<1x384xi32>
    %3 = arith.cmpi sge, %1, %2 : vector<1x384xi32>
    %c128_i32_1 = arith.constant 128 : i32
    %4 = vector.broadcast %c128_i32_1 : i32 to vector<1x384xi32>
    %5 = arith.subi %1, %4 : vector<1x384xi32>
    %6 = arith.select %3, %5, %1 : vector<1x384xi1>, vector<1x384xi32>
    %c128_i32_2 = arith.constant 128 : i32
    %7 = vector.broadcast %c128_i32_2 : i32 to vector<1x384xi32>
    %8 = arith.cmpi sge, %6, %7 : vector<1x384xi32>
    %c128_i32_3 = arith.constant 128 : i32
    %9 = vector.broadcast %c128_i32_3 : i32 to vector<1x384xi32>
    %10 = arith.subi %6, %9 : vector<1x384xi32>
    %11 = arith.select %8, %10, %6 : vector<1x384xi1>, vector<1x384xi32>
    %12 = vector.broadcast %0 : vector<16x1xi32> to vector<16x384xi32>
    %13 = vector.broadcast %11 : vector<1x384xi32> to vector<16x384xi32>
    %14 = arith.cmpi eq, %12, %13 : vector<16x384xi32>
    %15 = arith.extui %14 : vector<16x384xi1> to vector<16x384xi32>
    %16 = arith.sitofp %15 : vector<16x384xi32> to vector<16x384xf32>
    %17 = arith.truncf %16 : vector<16x384xf32> to vector<16x384xbf16>
    %c0_4 = arith.constant 0 : index
    %c0_5 = arith.constant 0 : index
    %18 = vector.load %arg2[%c0_4, %c0_5] : memref<384x48xbf16, #tpu.memory_space<vmem>>, vector<384x48xbf16>
    %cst = arith.constant dense<0.000000e+00> : vector<16x48xf32>
    %19 = tpu.matmul %17, %18, %cst {dimension_numbers = #tpu.dot_dimension_numbers<[1], [0], [0], [1], [0, 0, 1, 1], [], []>} : vector<16x384xbf16>, vector<384x48xbf16>, vector<16x48xf32> -> vector<16x48xf32>
    %c0_6 = arith.constant 0 : index
    %c0_7 = arith.constant 0 : index
    %20 = vector.load %arg3[%c0_6, %c0_7] : memref<16x48xf32, #tpu.memory_space<vmem>>, vector<16x48xf32>
    tpu.vector_store %arg3[%c0_6, %c0_7], %19 {strides = array<i32>} : memref<16x48xf32, #tpu.memory_space<vmem>>, vector<16x48xf32>,
    return
  }
  func.func @transform_0(%arg0: i32) -> (i32, i32) {
    %c0_i32 = arith.constant 0 : i32
    %c0_i32_0 = arith.constant 0 : i32
    return %arg0, %c0_i32 : i32, i32
  }
  func.func @transform_1(%arg0: i32) -> (i32, i32) {
    %c0_i32 = arith.constant 0 : i32
    %c0_i32_0 = arith.constant 0 : i32
    %c0_i32_1 = arith.constant 0 : i32
    return %c0_i32, %c0_i32_0 : i32, i32
  }
  func.func @transform_2(%arg0: i32) -> (i32, i32) {
    %c0_i32 = arith.constant 0 : i32
    %c0_i32_0 = arith.constant 0 : i32
    return %arg0, %c0_i32 : i32, i32
  }
}

</mosaic_0001>

<bundles_post_ra>
// kernel: tpu_custom_call.1
= control target key start
LH: loop header
LB: loop body
LE: loop exit
PB: predicated region body
PF: predicated region fallthrough
CT: control target
= control target key end

     0   :  { %v502_v1 = vmov 0   ;;  %v503_v3 = vmov 0.0   ;;  %vm504_vm0 = vmmov 0   ;;  %s605_s0 = inlined_call_operand.vmem [shape: s32[16,1], index: 0, kind: input, shape index: {}]   ;;  %s606_s1 = inlined_call_operand.vmem [shape: bf16[384,48], index: 1, kind: input, shape index: {}]   ;;  %s607_s2 = inlined_call_operand.hbm [shape: f32[16,48], index: 2, kind: output, shape index: {}]  }
   0x1   :  { %v13_v0 = vld [vmem:[%s605_s0] sm:$0xff]  ;;  %455 = vset.pattern.permute.xlu0 %v502_v1  ;;  %v14_v2 = vld [vmem:[%s605_s0 + $0x8] sm:$0xff]  ;;  %428 = vmatprep.subr.bf16.mxu1 %v503_v3  ;;  %v456_v4 = vld [vmem:[%s606_s1 + $0x78] sm:$0xff]  }
   0x2   :  { %37 = vperm.xlu0 %455, %v13_v0   ;;  %v457_v5 = vld [vmem:[%s606_s1 + $0xb8] sm:$0xff]   ;;  %397 = vmatprep.subr.bf16.mxu0 %v456_v4  ;;  %v459_v7 = vld [vmem:[%s606_s1 + $0x70] sm:$0xff]   ;;  %v462_v10 = vld [vmem:[%s606_s1 + $0x68] sm:$0xff]  }
   0x3   :  { %v458_v6 = vld [vmem:[%s606_s1 + $0x38] sm:$0xff]   ;;  %429 = vmatpush3.bf16.msra.mxu1 %v457_v5  ;;  %444 = vmatprep.mubr.msk.bf16.mxu1 %vm504_vm0, %v503_v3  ;;  %v460_v8 = vld [vmem:[%s606_s1 + $0xb0] sm:$0xff]   ;;  %v463_v11 = vld [vmem:[%s606_s1 + $0xa8] sm:$0xff]  }
   0x4   :  { %398 = vmatpush3.bf16.msra.mxu0 %v458_v6  ;;  %430 = vmatprep.subr.bf16.mxu1 %v503_v3  ;;  %v461_v9 = vld [vmem:[%s606_s1 + $0x30] sm:$0xff]   ;;  %v464_v12 = vld [vmem:[%s606_s1 + $0x28] sm:$0xff]   ;;  %v465_v13 = vld [vmem:[%s606_s1 + $0x60] sm:$0xff]  }
   0x5   :  { %399 = vmatprep.subr.bf16.mxu0 %v459_v7  ;;  %v466_v14 = vld [vmem:[%s606_s1 + $0xa0] sm:$0xff]   ;;  %v468_v16 = vld [vmem:[%s606_s1 + $0x58] sm:$0xff]   ;;  %v471_v19 = vld [vmem:[%s606_s1 + $0x50] sm:$0xff]  }
   0x6   :  { %40 = vperm.xlu0 %455, %v14_v2   ;;  %v467_v15 = vld [vmem:[%s606_s1 + $0x20] sm:$0xff]   ;;  %v469_v17 = vld [vmem:[%s606_s1 + $0x98] sm:$0xff]   ;;  %v472_v20 = vld [vmem:[%s606_s1 + $0x90] sm:$0xff]  }
   0x7   :  { %431 = vmatpush3.bf16.msra.mxu1 %v460_v8  ;;  %v470_v18 = vld [vmem:[%s606_s1 + $0x18] sm:$0xff]   ;;  %v473_v21 = vld [vmem:[%s606_s1 + $0x10] sm:$0xff]   ;;  %v474_v22 = vld [vmem:[%s606_s1 + $0x48] sm:$0xff]  }
   0x8   :  { %400 = vmatpush3.bf16.msra.mxu0 %v461_v9  ;;  %432 = vmatprep.subr.bf16.mxu1 %v503_v3  ;;  %v475_v23 = vld [vmem:[%s606_s1 + $0x88] sm:$0xff]  }
   0x9   :  { %401 = vmatprep.subr.bf16.mxu0 %v462_v10  ;;  %v476_v24 = vld [vmem:[%s606_s1 + $0x8] sm:$0xff]  }
   0xb   :  { %433 = vmatpush3.bf16.msra.mxu1 %v463_v11 }
   0xc   :  { %402 = vmatpush3.bf16.msra.mxu0 %v464_v12  ;;  %434 = vmatprep.subr.bf16.mxu1 %v503_v3 }
   0xd   :  { %403 = vmatprep.subr.bf16.mxu0 %v465_v13 }
   0xf   :  { %435 = vmatpush3.bf16.msra.mxu1 %v466_v14 }
  0x10   :  { %404 = vmatpush3.bf16.msra.mxu0 %v467_v15  ;;  %436 = vmatprep.subr.bf16.mxu1 %v503_v3 }
  0x11   :  { %405 = vmatprep.subr.bf16.mxu0 %v468_v16 }
  0x13   :  { %437 = vmatpush3.bf16.msra.mxu1 %v469_v17 }
  0x14   :  { %406 = vmatpush3.bf16.msra.mxu0 %v470_v18  ;;  %438 = vmatprep.subr.bf16.mxu1 %v503_v3 }
  0x15   :  { %407 = vmatprep.subr.bf16.mxu0 %v471_v19 }
  0x17   :  { %439 = vmatpush3.bf16.msra.mxu1 %v472_v20 }
  0x18   :  { %408 = vmatpush3.bf16.msra.mxu0 %v473_v21  ;;  %440 = vmatprep.subr.bf16.mxu1 %v503_v3 }
  0x19   :  { %7 = vsyncpa [#allocation3], 0  ;;  %409 = vmatprep.subr.bf16.mxu0 %v474_v22  ;;  %v477_v25 = vld [vmem:[%s606_s1 + $0x40] sm:$0xff]   ;;  %v15_v28 = vlaneseq  ;;  %v505_v35 = vmov 1.0|1.0   ;;  %vm337_vm7 = vcmask 392192  }
  0x1a   :  { %v478_v26 = vld [vmem:[%s606_s1 + $0x80] sm:$0xff]  }
  0x1b   :  { %441 = vmatpush3.bf16.msra.mxu1 %v475_v23  ;;  %v479_v27 = vld [vmem:[%s606_s1] sm:$0xff]   ;;  %v16_v29 = vand.u32 127, %v15_v28  ;;  %s506_s1 = smov [#allocation2]  }
  0x1c   :  { %410 = vmatpush3.bf16.msra.mxu0 %v476_v24  ;;  %442 = vmatprep.subr.bf16.mxu1 %v503_v3  ;;  %s345_s3 = sshll.u32 %s506_s1, 4  ;;  %s346_s3 = int_to_ptr.vmem [resolvable:$true] %s345_s3 }
  0x1d   :  { %411 = vmatprep.subr.bf16.mxu0 %v477_v25  ;;  %v18_v30 = vadd.s32 256, %v16_v29  ;;  %s480_s4 = scalar_lea.vmem %s346_s3, 256  ;;  %p485_p1 = scmp.lt.s32.totalorder %s346_s3, %s346_s3 }
  0x1e   :  { %p481_p0 = scmp.ne.s32.totalorder %s346_s3, %s480_s4  ;;  %p486_p2 = scmp.lt.s32.totalorder %s480_s4, %s480_s4 }
  0x1f   :  { %443 = vmatpush3.bf16.msra.mxu1 %v478_v26  ;;  %v357_v31 = vadd.s32 4294967168, %v18_v30 }
  0x20   :  { %412 = vmatpush3.bf16.msra.mxu0 %v479_v27  ;;  %p487_p3 = por %p486_p2, %p485_p1 }
  0x21   :  { %v360_v33 = vadd.s32 4294967168, %v357_v31 }
  0x22   :  { %p488_p4 = pnand %p487_p3, %p481_p0 }
  0x7d   :  { %v38_v32 = vpop.permute.xlu0 %37 }
  0x7e   :  { %vm44_vm1 = vcmp.eq.s32.totalorder %v38_v32, %v360_v33  ;;  %vm42_vm5 = vcmp.eq.s32.totalorder %v38_v32, %v16_v29 }
  0x81   :  { %v41_v34 = vpop.permute.xlu0 %40 }
  0x82   :  { %vm45_vm2 = vcmp.eq.s32.totalorder %v41_v34, %v16_v29  ;;  %vm47_vm3 = vcmp.eq.s32.totalorder %v41_v34, %v360_v33 }
  0x83   :  { %vm395_vm4 = vmpackc.low %vm47_vm3, %vm44_vm1 }
  0x84   :  { %vm391_vm6 = vmpackc.low %vm45_vm2, %vm42_vm5  ;;  %445 = vmatmul.mubr.msk.bf16.vlgmr.msra.gmra.mxu1 %vm395_vm4, %v505_v35 }
  0x85   :  { %392 = vmatprep.mubr.msk.bf16.mxu0 %vm391_vm6, %v505_v35 }
  0x86   :  { %394 = vmatmul.mubr.msk.bf16.vlgmr.msra.gmra.mxu0 %vm391_vm6, %v505_v35 }
 0x144   :  { %v330_v36 = vpop.f32.mrf.mxu1 }
 0x146   :  { %v413_v37 = vpop.f32.mrf.mxu0  ;;  %v446_v38 = vpop.f32.mrf.mxu1 }
 0x148   :  { %v414_v39 = vpop.f32.mrf.mxu0  ;;  %v333_v40 = vpop.f32.mrf.mxu1 }
 0x149   :  { %v415_v41 = vadd.f32 %v414_v39, %v413_v37 }
 0x14a   :  { %v416_v42 = vpop.f32.mrf.mxu0  ;;  %v447_v43 = vpop.f32.mrf.mxu1 }
 0x14b   :  { %v331_v44 = vadd.f32 %v415_v41, %v330_v36 }
 0x14c   :  { %v417_v45 = vpop.f32.mrf.mxu0 }
 0x14d   :  { %338 = vst.msk [vmem:[#allocation2] sm:$0xff] %vm337_vm7, %v331_v44  ;;  %v418_v46 = vadd.f32 %v417_v45, %v416_v42 }
 0x14f   :  { %v334_v47 = vadd.f32 %v418_v46, %v333_v40 }
 0x151   :  { %339 = vst.msk [vmem:[#allocation2 + $0x8] sm:$0xff] %vm337_vm7, %v334_v47 }
 0x152   :  { %491 = shalt.err (!%p488_p4)
}
 0x153   :  { %s507_s5 = smov 128   ;;  %s508_s6 = smov 8  }
 0x154   :  { %351 = dma.vmem_to_hbm [thread:$0]  %s346_s3, 256, %s607_s2, [#allocation3], %s507_s5, %s507_s5, %s508_s6  }
 0x155   :  { %500 = dma.done.wait [#allocation3], 256  }
 0x156   :  { %501 = vsyncadd [#allocation3], 4294967040 }
 0x157   :  { %355 = vsyncpa [#allocation3], 1 }

</bundles_post_ra>
